<compile_context>
chip_gen: v5e
topology: v5e:2x2
jax: 0.10.0
libtpu: 0.0.40
codegen_flags: <defaults>
</compile_context>

<pallas_src>
import functools
import math

import jax
import jax.numpy as jnp
from jax.experimental import pallas as pl

LANE = 128     # last-dim (lane) tile width
SUBLANE = 8    # second-to-last-dim (sublane) tile width for f32


def _round_up(x: int, m: int) -> int:
    return ((x + m - 1) // m) * m


def _fused_mlp_kernel(*refs, num_layers: int):
    """Entire MLP in one kernel body.

    refs = (x_ref, w0_ref, b0_ref, ..., w_{L-1}_ref, b_{L-1}_ref, o_ref)
    All operands are zero-padded to lane/sublane-dense shapes.
    """
    x_ref = refs[0]
    o_ref = refs[-1]

    h = x_ref[...]                                  # f32 activations
    for layer in range(num_layers):
        w_ref = refs[1 + 2 * layer]                 # bf16 weights (pre-cast)
        b_ref = refs[2 + 2 * layer]                 # f32 bias, shape (1, Dout)
        # MXU matmul in bf16 with f32 accumulation.
        y = jnp.dot(h.astype(w_ref.dtype), w_ref[...],
                    preferred_element_type=jnp.float32)
        y = y + b_ref[...]                          # (1, Dout) broadcasts over batch
        if layer < num_layers - 1:                  # hidden layers: ReLU
            y = jnp.maximum(y, 0.0)
        h = y
    o_ref[...] = h.astype(o_ref.dtype)


def prepare_params(params, mxu_dtype=jnp.bfloat16):
    """One-time preparation: pad weights/biases to lane-dense tiles, cast weights.

    Call once at init (or cache the result); pass the returned structure to
    mlp_forward. This hoists all per-weight pad / cast XLA ops out of the
    per-call forward path (the single biggest real-world win per the review).
    """
    padded_ws, padded_bs = [], []
    for w, b in params:
        din, dout = w.shape
        din_p, dout_p = _round_up(din, LANE), _round_up(dout, LANE)
        w_p = jnp.zeros((din_p, dout_p), mxu_dtype).at[:din, :dout].set(
            w.astype(mxu_dtype))
        b_p = jnp.zeros((1, dout_p), jnp.float32).at[0, :dout].set(
            b.astype(jnp.float32))
        padded_ws.append(w_p)
        padded_bs.append(b_p)
    return {
        "ws": tuple(padded_ws),          # pre-padded, pre-cast (bf16) weights
        "bs": tuple(padded_bs),          # pre-padded f32 biases, shape (1, Dout_p)
        "out_size": int(params[-1][1].shape[0]),
    }


@functools.partial(jax.jit, static_argnames=("out_size",))
def _forward_jit(state, ws, bs, out_size):
    """Jitted forward: pad x, run the fused kernel, slice back. Weights are
    already padded/cast (see prepare_params)."""
    B, in_size = state.shape
    num_layers = len(ws)

    Bp = _round_up(B, SUBLANE)
    in_p = ws[0].shape[0]
    out_p = ws[-1].shape[1]

    x_p = jnp.zeros((Bp, in_p), jnp.float32).at[:B, :in_size].set(
        state.astype(jnp.float32))

    operands = [x_p]
    in_specs = [pl.BlockSpec((Bp, in_p), lambda: (0, 0))]
    flops = 0
    bytes_accessed = x_p.size * 4 + Bp * out_p * 4
    for w_p, b_p in zip(ws, bs):
        flops += 2 * Bp * w_p.shape[0] * w_p.shape[1]
        bytes_accessed += (w_p.size * w_p.dtype.itemsize + b_p.size * 4)
        in_specs.append(pl.BlockSpec(w_p.shape, lambda: (0, 0)))
        in_specs.append(pl.BlockSpec(b_p.shape, lambda: (0, 0)))
        operands.extend([w_p, b_p])

    kernel = functools.partial(_fused_mlp_kernel, num_layers=num_layers)

    out_padded = pl.pallas_call(
        kernel,
        out_shape=jax.ShapeDtypeStruct((Bp, out_p), jnp.float32),
        # No grid: every array is a single full block resident in VMEM
        # (all padded shapes are (8,128)-aligned; this tiny MLP fits easily).
        in_specs=in_specs,
        out_specs=pl.BlockSpec((Bp, out_p), lambda: (0, 0)),
        cost_estimate=pl.CostEstimate(
            flops=int(flops), transcendentals=0,
            bytes_accessed=int(bytes_accessed)),
    )(*operands)

    # Slice padded result back to the logical shape.
    return out_padded[:B, :out_size].astype(state.dtype)


def mlp_forward(state: jax.Array, prepared) -> jax.Array:
    """state: [B, input_size]; prepared: output of prepare_params()."""
    return _forward_jit(state, prepared["ws"], prepared["bs"],
                        out_size=prepared["out_size"])


def init_mlp_params(key, input_size: int, hidden_sizes, output_size: int):
    """Init matching nn.Linear's default U(-1/sqrt(fan_in), 1/sqrt(fan_in))."""
    params = []
    sizes = [input_size] + list(hidden_sizes) + [output_size]
    for i in range(len(sizes) - 1):
        din, dout = sizes[i], sizes[i + 1]
        key, kw, kb = jax.random.split(key, 3)
        bound = 1.0 / math.sqrt(din)
        w = jax.random.uniform(kw, (din, dout), jnp.float32, -bound, bound)
        b = jax.random.uniform(kb, (dout,), jnp.float32, -bound, bound)
        params.append((w, b))
    return params


if __name__ == "__main__":
    key = jax.random.PRNGKey(0)
    key, kx = jax.random.split(key)

    batch = 4
    input_size = 12
    hidden_sizes = [32, 24]
    output_size = 5

    x = jax.random.normal(kx, (batch, input_size), jnp.float32)
    params = init_mlp_params(key, input_size, hidden_sizes, output_size)

    # One-time weight preparation (padding + bf16 cast), hoisted out of the
    # forward path.
    prepared = jax.tree_util.tree_map(jax.block_until_ready,
                                      prepare_params(params))

    out = jax.block_until_ready(mlp_forward(x, prepared))
    # Second call exercises the cached jit path (no retrace / re-pad of weights).
    out = jax.block_until_ready(mlp_forward(x, prepared))

    # Reference in plain JAX f32 (same math as the PyTorch module).
    ref = x
    for w, b in params[:-1]:
        ref = jnp.maximum(ref @ w + b, 0.0)
    ref = ref @ params[-1][0] + params[-1][1]

    assert out.shape == (batch, output_size)
    # bf16 MXU weight path with f32 accumulation -> loosened tolerance.
    assert jnp.allclose(out, ref, atol=5e-2, rtol=5e-2), (
        f"max abs err {jnp.max(jnp.abs(out - ref))}")

    print("KERNEL_OK")
</pallas_src>

<mosaic_0001>
module attributes {stable_mosaic.version = 11 : i64} {
  func.func @_fused_mlp_kernel(%arg0: memref<8x128xf32, #tpu.memory_space<vmem>>, %arg1: memref<128x128xbf16, #tpu.memory_space<vmem>>, %arg2: memref<1x128xf32, #tpu.memory_space<vmem>>, %arg3: memref<128x128xbf16, #tpu.memory_space<vmem>>, %arg4: memref<1x128xf32, #tpu.memory_space<vmem>>, %arg5: memref<128x128xbf16, #tpu.memory_space<vmem>>, %arg6: memref<1x128xf32, #tpu.memory_space<vmem>>, %arg7: memref<8x128xf32, #tpu.memory_space<vmem>>) attributes {dimension_semantics = [], scalar_prefetch = 0 : i64, scratch_operands = 0 : i64, tpu.core_type = #tpu.core_type<tc>} {
    %c0 = arith.constant 0 : index
    %c0_0 = arith.constant 0 : index
    %0 = vector.load %arg0[%c0, %c0_0] : memref<8x128xf32, #tpu.memory_space<vmem>>, vector<8x128xf32>
    %1 = arith.truncf %0 : vector<8x128xf32> to vector<8x128xbf16>
    %c0_1 = arith.constant 0 : index
    %c0_2 = arith.constant 0 : index
    %2 = vector.load %arg1[%c0_1, %c0_2] : memref<128x128xbf16, #tpu.memory_space<vmem>>, vector<128x128xbf16>
    %cst = arith.constant dense<0.000000e+00> : vector<8x128xf32>
    %3 = tpu.matmul %1, %2, %cst {dimension_numbers = #tpu.dot_dimension_numbers<[1], [0], [0], [1], [0, 0, 1, 1], [], []>} : vector<8x128xbf16>, vector<128x128xbf16>, vector<8x128xf32> -> vector<8x128xf32>
    %c0_3 = arith.constant 0 : index
    %c0_4 = arith.constant 0 : index
    %4 = vector.load %arg2[%c0_3, %c0_4] : memref<1x128xf32, #tpu.memory_space<vmem>>, vector<1x128xf32>
    %5 = vector.broadcast %4 : vector<1x128xf32> to vector<8x128xf32>
    %6 = arith.addf %3, %5 : vector<8x128xf32>
    %cst_5 = arith.constant 0.000000e+00 : f32
    %7 = vector.broadcast %cst_5 : f32 to vector<8x128xf32>
    %8 = arith.maximumf %6, %7 : vector<8x128xf32>
    %9 = arith.truncf %8 : vector<8x128xf32> to vector<8x128xbf16>
    %c0_6 = arith.constant 0 : index
    %c0_7 = arith.constant 0 : index
    %10 = vector.load %arg3[%c0_6, %c0_7] : memref<128x128xbf16, #tpu.memory_space<vmem>>, vector<128x128xbf16>
    %cst_8 = arith.constant dense<0.000000e+00> : vector<8x128xf32>
    %11 = tpu.matmul %9, %10, %cst_8 {dimension_numbers = #tpu.dot_dimension_numbers<[1], [0], [0], [1], [0, 0, 1, 1], [], []>} : vector<8x128xbf16>, vector<128x128xbf16>, vector<8x128xf32> -> vector<8x128xf32>
    %c0_9 = arith.constant 0 : index
    %c0_10 = arith.constant 0 : index
    %12 = vector.load %arg4[%c0_9, %c0_10] : memref<1x128xf32, #tpu.memory_space<vmem>>, vector<1x128xf32>
    %13 = vector.broadcast %12 : vector<1x128xf32> to vector<8x128xf32>
    %14 = arith.addf %11, %13 : vector<8x128xf32>
    %cst_11 = arith.constant 0.000000e+00 : f32
    %15 = vector.broadcast %cst_11 : f32 to vector<8x128xf32>
    %16 = arith.maximumf %14, %15 : vector<8x128xf32>
    %17 = arith.truncf %16 : vector<8x128xf32> to vector<8x128xbf16>
    %c0_12 = arith.constant 0 : index
    %c0_13 = arith.constant 0 : index
    %18 = vector.load %arg5[%c0_12, %c0_13] : memref<128x128xbf16, #tpu.memory_space<vmem>>, vector<128x128xbf16>
    %cst_14 = arith.constant dense<0.000000e+00> : vector<8x128xf32>
    %19 = tpu.matmul %17, %18, %cst_14 {dimension_numbers = #tpu.dot_dimension_numbers<[1], [0], [0], [1], [0, 0, 1, 1], [], []>} : vector<8x128xbf16>, vector<128x128xbf16>, vector<8x128xf32> -> vector<8x128xf32>
    %c0_15 = arith.constant 0 : index
    %c0_16 = arith.constant 0 : index
    %20 = vector.load %arg6[%c0_15, %c0_16] : memref<1x128xf32, #tpu.memory_space<vmem>>, vector<1x128xf32>
    %21 = vector.broadcast %20 : vector<1x128xf32> to vector<8x128xf32>
    %22 = arith.addf %19, %21 : vector<8x128xf32>
    %c0_17 = arith.constant 0 : index
    %c0_18 = arith.constant 0 : index
    %23 = vector.load %arg7[%c0_17, %c0_18] : memref<8x128xf32, #tpu.memory_space<vmem>>, vector<8x128xf32>
    tpu.vector_store %arg7[%c0_17, %c0_18], %22 {strides = array<i32>} : memref<8x128xf32, #tpu.memory_space<vmem>>, vector<8x128xf32>,
    return
  }
}

</mosaic_0001>

<bundles_post_ra>
// kernel: _forward_jit.1
= control target key start
LH: loop header
LB: loop body
LE: loop exit
PB: predicated region body
PF: predicated region fallthrough
CT: control target
= control target key end

     0   :  { %12 = vsyncpa [#allocation3], 0  ;;  %s602_s0 = inlined_call_operand.vmem [shape: f32[8,128], index: 0, kind: input, shape index: {}]   ;;  %s603_s1 = inlined_call_operand.hbm [shape: bf16[128,128], index: 1, kind: input, shape index: {}]   ;;  %s604_s2 = inlined_call_operand.vmem [shape: f32[1,128], index: 2, kind: input, shape index: {}]   ;;  %s605_s3 = inlined_call_operand.hbm [shape: bf16[128,128], index: 3, kind: input, shape index: {}]   ;;  %s606_s4 = inlined_call_operand.vmem [shape: f32[1,128], index: 4, kind: input, shape index: {}]   ;;  %s607_s5 = inlined_call_operand.hbm [shape: bf16[128,128], index: 5, kind: input, shape index: {}]   ;;  %s608_s6 = inlined_call_operand.vmem [shape: f32[1,128], index: 6, kind: input, shape index: {}]   ;;  %s609_s7 = inlined_call_operand.vmem [shape: f32[8,128], index: 7, kind: output, shape index: {}]  }
   0x1   :  { %13 = vsyncpa [#allocation5], 0  ;;  %s35_s26 = sshll.u32 %s605_s3, 4  ;;  %s533_s27 = smov [#allocation4]   ;;  %s36_s26 = int_to_ptr.hbm [resolvable:$true] %s35_s26 }
   0x2   :  { %s37_s28 = sshll.u32 %s533_s27, 4  ;;  %s20_s8 = sshll.u32 %s603_s1, 4  ;;  %s38_s28 = int_to_ptr.vmem [resolvable:$true] %s37_s28  ;;  %s21_s8 = int_to_ptr.hbm [resolvable:$true] %s20_s8 }
   0x3   :  { %s534_s9 = smov 64   ;;  %s535_s10 = smov 4  }
   0x4   :  { %43 = dma.hbm_to_vmem [thread:$0]  %s36_s26, 1024, %s38_s28, [#allocation5], %s534_s9, %s534_s9, %s535_s10  }
   0x5   :  { %s536_s11 = smov [#allocation2]   ;;  %s50_s15 = sshll.u32 %s607_s5, 4  ;;  %s51_s15 = int_to_ptr.hbm [resolvable:$true] %s50_s15 }
   0x6   :  { %s22_s12 = sshll.u32 %s536_s11, 4  ;;  %s537_s3 = smov [#allocation6]   ;;  %s23_s12 = int_to_ptr.vmem [resolvable:$true] %s22_s12 }
   0x7   :  { %28 = dma.hbm_to_vmem [thread:$0]  %s21_s8, 1024, %s23_s12, [#allocation3], %s534_s9, %s534_s9, %s535_s10  }
   0x8   :  { %s52_s16 = sshll.u32 %s537_s3, 4  ;;  %s53_s16 = int_to_ptr.vmem [resolvable:$true] %s52_s16 }
   0x9   :  { %58 = dma.hbm_to_vmem [thread:$0]  %s51_s15, 1024, %s53_s16, [#allocation5], %s534_s9, %s534_s9, %s535_s10  }
   0xa   :  { %529 = dma.done.wait [#allocation3], 1024  }
   0xb   :  { %530 = vsyncadd [#allocation3], 4294966272 }
   0xc   :  { %531 = dma.done.wait [#allocation5], 2048  }
   0xd   :  { %532 = vsyncadd [#allocation5], 4294965248  ;;  %v432_v0 = vld [vmem:[#allocation2 + $0x38] sm:$0xff]  ;;  %v431_v1 = vld [vmem:[#allocation2 + $0x30] sm:$0xff] }
   0xe   :  { %143 = vmatpush.bf16.msra.mxu0 %v432_v0  ;;  %v440_v2 = vld [vmem:[#allocation4 + $0x38] sm:$0xff]  ;;  %v439_v3 = vld [vmem:[#allocation4 + $0x30] sm:$0xff]  ;;  %v430_v4 = vld [vmem:[#allocation2 + $0x28] sm:$0xff] }
   0xf   :  { %226 = vmatpush.bf16.msra.mxu1 %v440_v2  ;;  %v438_v5 = vld [vmem:[#allocation4 + $0x28] sm:$0xff]  ;;  %v429_v6 = vld [vmem:[#allocation2 + $0x20] sm:$0xff]  ;;  %v428_v8 = vld [vmem:[#allocation2 + $0x18] sm:$0xff] }
  0x10   :  { %v437_v7 = vld [vmem:[#allocation4 + $0x20] sm:$0xff]  ;;  %v436_v9 = vld [vmem:[#allocation4 + $0x18] sm:$0xff]  ;;  %v427_v10 = vld [vmem:[#allocation2 + $0x10] sm:$0xff] }
  0x11   :  { %v435_v11 = vld [vmem:[#allocation4 + $0x10] sm:$0xff]  ;;  %v426_v12 = vld [vmem:[#allocation2 + $0x8] sm:$0xff]  ;;  %v425_v13 = vld [vmem:[#allocation2] sm:$0xff] }
  0x12   :  { %144 = vmatpush.bf16.msra.mxu0 %v431_v1  ;;  %v73_v14 = vld [vmem:[%s602_s0] sm:$0xff]  ;;  %v434_v16 = vld [vmem:[#allocation4 + $0x8] sm:$0xff]  ;;  %v448_v18 = vld [vmem:[#allocation6 + $0x38] sm:$0xff] }
  0x13   :  { %227 = vmatpush.bf16.msra.mxu1 %v439_v3  ;;  %v74_v15 = vpack.c.bf16 %v73_v14, %v73_v14  ;;  %v433_v17 = vld [vmem:[#allocation4] sm:$0xff]  ;;  %309 = vmatpush.bf16.msra.mxu2 %v448_v18  ;;  %v447_v19 = vld [vmem:[#allocation6 + $0x30] sm:$0xff]  ;;  %v446_v20 = vld [vmem:[#allocation6 + $0x28] sm:$0xff] }
  0x14   :  { %v445_v21 = vld [vmem:[#allocation6 + $0x20] sm:$0xff]  ;;  %v444_v22 = vld [vmem:[#allocation6 + $0x18] sm:$0xff]  ;;  %v443_v23 = vld [vmem:[#allocation6 + $0x10] sm:$0xff] }
  0x15   :  { %v454_v24 = vld [vmem:[%s604_s2] ss:$0 sm:$0xff]  ;;  %v442_v30 = vld [vmem:[#allocation6 + $0x8] sm:$0xff] }
  0x16   :  { %145 = vmatpush.bf16.msra.mxu0 %v430_v4  ;;  %v441_v31 = vld [vmem:[#allocation6] sm:$0xff] }
  0x17   :  { %228 = vmatpush.bf16.msra.mxu1 %v438_v5  ;;  %310 = vmatpush.bf16.msra.mxu2 %v447_v19  ;;  %v455_v32 = vld [vmem:[%s606_s4] ss:$0 sm:$0xff] }
  0x18   :  { %v456_v38 = vld [vmem:[%s608_s6] ss:$0 sm:$0xff] }
  0x1a   :  { %146 = vmatpush.bf16.msra.mxu0 %v429_v6 }
  0x1b   :  { %229 = vmatpush.bf16.msra.mxu1 %v437_v7  ;;  %311 = vmatpush.bf16.msra.mxu2 %v446_v20 }
  0x1e   :  { %147 = vmatpush.bf16.msra.mxu0 %v428_v8 }
  0x1f   :  { %230 = vmatpush.bf16.msra.mxu1 %v436_v9  ;;  %312 = vmatpush.bf16.msra.mxu2 %v445_v21 }
  0x22   :  { %148 = vmatpush.bf16.msra.mxu0 %v427_v10 }
  0x23   :  { %231 = vmatpush.bf16.msra.mxu1 %v435_v11  ;;  %313 = vmatpush.bf16.msra.mxu2 %v444_v22 }
  0x26   :  { %149 = vmatpush.bf16.msra.mxu0 %v426_v12 }
  0x27   :  { %232 = vmatpush.bf16.msra.mxu1 %v434_v16  ;;  %314 = vmatpush.bf16.msra.mxu2 %v443_v23 }
  0x2a   :  { %150 = vmatpush.bf16.msra.mxu0 %v425_v13 }
  0x2b   :  { %233 = vmatpush.bf16.msra.mxu1 %v433_v17  ;;  %315 = vmatpush.bf16.msra.mxu2 %v442_v30 }
  0x2d   :  { %151 = vmatmul.bf16.vlgmr.msra.gmra.mxu0 %v74_v15 }
  0x2f   :  { %316 = vmatpush.bf16.msra.mxu2 %v441_v31 }
  0xaa   :  { %v152_v25 = vpop.f32.mrf.mxu0 }
  0xab   :  { %v153_v26 = vadd.f32 %v454_v24, %v152_v25 }
  0xad   :  { %v156_v27 = vmax.f32 %v153_v26, 0.0 }
  0xaf   :  { %v157_v28 = vpack.c.bf16 %v156_v27, %v156_v27 }
  0xb1   :  { %234 = vmatmul.bf16.vlgmr.msra.gmra.mxu1 %v157_v28 }
  0xb2   :  { %v154_v29 = vpop.f32.mrf.mxu0 }
 0x12e   :  { %v235_v33 = vpop.f32.mrf.mxu1 }
 0x12f   :  { %v236_v34 = vadd.f32 %v455_v32, %v235_v33 }
 0x131   :  { %v239_v35 = vmax.f32 %v236_v34, 0.0 }
 0x133   :  { %v240_v36 = vpack.c.bf16 %v239_v35, %v239_v35 }
 0x135   :  { %317 = vmatmul.bf16.vlgmr.msra.gmra.mxu2 %v240_v36 }
 0x136   :  { %v237_v37 = vpop.f32.mrf.mxu1 }
 0x1b8   :  { %v318_v39 = vpop.f32.mrf.mxu2 }
 0x1b9   :  { %v319_v40 = vadd.f32 %v456_v38, %v318_v39 }
 0x1bb   :  { %322 = vst [vmem:[%s609_s7] sm:$0xff] %v319_v40 }
 0x1c0   :  { %v320_v41 = vpop.f32.mrf.mxu2 }
 0x1c1   :  { %327 = vsyncpa [#allocation3], 1 }
 0x1c2   :  { %328 = vsyncpa [#allocation5], 1 }

</bundles_post_ra>
